<compile_context>
chip_gen: v7x
topology: tpu7x:2x2x1
jax: 0.10.0
libtpu: 0.0.40
codegen_flags: <defaults>
</compile_context>

<pallas_src>
import math

import numpy as np
import jax
import jax.numpy as jnp
from jax.experimental import pallas as pl
from jax.experimental.pallas import tpu as pltpu

_LOG_2PI = math.log(2.0 * math.pi)


def _round_up(x, m):
    return ((x + m - 1) // m) * m


# --------------------------------------------------------------------------- #
# Kernel (feature-major: batch on lanes)
# --------------------------------------------------------------------------- #
def ppo_forward_kernel(obsT_ref, epsT_ref,
                       w1_ref, b1_ref, w2_ref, b2_ref, w3_ref, b3_ref,
                       std_ref, c_ref,
                       a_ref, v_ref, logp_ref):
    act_dim = epsT_ref.shape[0]

    obsT = obsT_ref[...]                                    # (obs_dim, TB) f32

    # fused actor|critic layer 1: (2*h1, obs_dim) @ (obs_dim, TB)
    h = jnp.tanh(jnp.dot(w1_ref[...], obsT.astype(jnp.bfloat16),
                         preferred_element_type=jnp.float32) + b1_ref[...])
    # fused block-diagonal layer 2: (2*h2, 2*h1) @ (2*h1, TB)
    h = jnp.tanh(jnp.dot(w2_ref[...], h.astype(jnp.bfloat16),
                         preferred_element_type=jnp.float32) + b2_ref[...])
    # fused block-diagonal layer 3 -> [mu ; v]: (act_dim+1, 2*h2) @ (2*h2, TB)
    mv = jnp.dot(w3_ref[...], h.astype(jnp.bfloat16),
                 preferred_element_type=jnp.float32) + b3_ref[...]

    muT = mv[:act_dim, :]                                   # (act_dim, TB)
    vT = mv[act_dim:act_dim + 1, :]                         # (1, TB)

    epsT = epsT_ref[...]                                    # (act_dim, TB) f32

    # Normal(mu, std).sample() via reparameterization: a = mu + std * eps.
    a_ref[...] = muT + std_ref[...] * epsT
    v_ref[...] = vT
    # log_prob(a).sum(-1): (a - mu)/std == eps exactly, constants folded into C.
    logp_ref[...] = -0.5 * jnp.sum(epsT * epsT, axis=0, keepdims=True) + c_ref[0]


# --------------------------------------------------------------------------- #
# Parameter construction (PyTorch-style init) and fusion
# --------------------------------------------------------------------------- #
def init_linear(key, fan_in, fan_out):
    """PyTorch Linear default init: U(-1/sqrt(fan_in), 1/sqrt(fan_in))."""
    kw, kb = jax.random.split(key)
    bound = 1.0 / math.sqrt(fan_in)
    w = jax.random.uniform(kw, (fan_in, fan_out), jnp.float32, -bound, bound)
    b = jax.random.uniform(kb, (1, fan_out), jnp.float32, -bound, bound)
    return w, b


def init_ppo_params(key, obs_dim, act_dim, hidden_sizes):
    h1, h2 = hidden_sizes
    keys = jax.random.split(key, 6)
    # actor mu_net
    pw1, pb1 = init_linear(keys[0], obs_dim, h1)
    pw2, pb2 = init_linear(keys[1], h1, h2)
    pw3, pb3 = init_linear(keys[2], h2, act_dim)
    log_std = jnp.full((1, act_dim), -0.5, dtype=jnp.float32)
    # critic v_net
    vw1, vb1 = init_linear(keys[3], obs_dim, h1)
    vw2, vb2 = init_linear(keys[4], h1, h2)
    vw3, vb3 = init_linear(keys[5], h2, 1)
    return (pw1, pb1, pw2, pb2, pw3, pb3, log_std,
            vw1, vb1, vw2, vb2, vw3, vb3)


def fuse_ppo_params(params):
    """Transpose + concatenate / block-diagonalize actor+critic weights.

    Feature-major orientation (y^T = W^T @ x^T + b^T); bf16 MXU weights,
    f32 biases; std vector and folded logp constant precomputed.
    """
    (pw1, pb1, pw2, pb2, pw3, pb3, log_std,
     vw1, vb1, vw2, vb2, vw3, vb3) = params
    act_dim = pw3.shape[1]

    w1T = jnp.concatenate([pw1, vw1], axis=1).T.astype(jnp.bfloat16)    # (2*h1, obs)
    b1T = jnp.concatenate([pb1, vb1], axis=1).T                         # (2*h1, 1)
    w2T = jax.scipy.linalg.block_diag(pw2, vw2).T.astype(jnp.bfloat16)  # (2*h2, 2*h1)
    b2T = jnp.concatenate([pb2, vb2], axis=1).T                         # (2*h2, 1)
    w3T = jax.scipy.linalg.block_diag(pw3, vw3).T.astype(jnp.bfloat16)  # (act+1, 2*h2)
    b3T = jnp.concatenate([pb3, vb3], axis=1).T                         # (act+1, 1)

    std = jnp.exp(log_std).T.astype(jnp.float32)                        # (act, 1)
    # logp constant: -(sum(log_std) + 0.5*act_dim*log(2*pi))  -> SMEM scalar
    c = jnp.reshape(-(jnp.sum(log_std) + 0.5 * act_dim * _LOG_2PI),
                    (1,)).astype(jnp.float32)
    return (w1T, b1T, w2T, b2T, w3T, b3T, std, c)


# --------------------------------------------------------------------------- #
# Wrapper
# --------------------------------------------------------------------------- #
def ppo_forward(obs, eps, fused_params, *, block_b=8192):
    """Returns (a, v, logp_a) matching PPO.forward: (B, act_dim), (B,), (B,)."""
    w1T, b1T, w2T, b2T, w3T, b3T, std, c = fused_params
    B, obs_dim = obs.shape
    act_dim = eps.shape[1]

    # Batch sits on the 128-lane axis -> tile must be a multiple of 128.
    block_b = _round_up(max(128, min(block_b, _round_up(B, 128))), 128)
    B_pad = _round_up(B, block_b)

    # Feature-major layout (layout plumbing in the wrapper, lane-dense kernel).
    obsT = obs.T
    epsT = eps.T
    if B_pad != B:
        obsT = jnp.pad(obsT, ((0, 0), (0, B_pad - B)))
        epsT = jnp.pad(epsT, ((0, 0), (0, B_pad - B)))

    grid = (B_pad // block_b,)

    def batch_spec(d):
        # (features, batch-tile) block, walking the lane (batch) axis.
        return pl.BlockSpec((d, block_b), lambda i: (0, i))

    def resident_spec(arr):
        # full-array block, same index every step -> stays in VMEM, no re-DMA
        return pl.BlockSpec(arr.shape, lambda i: (0, 0))

    aT, vT, logpT = pl.pallas_call(
        ppo_forward_kernel,
        grid=grid,
        in_specs=[
            batch_spec(obs_dim),      # obs^T
            batch_spec(act_dim),      # eps^T
            resident_spec(w1T), resident_spec(b1T),
            resident_spec(w2T), resident_spec(b2T),
            resident_spec(w3T), resident_spec(b3T),
            resident_spec(std),
            pl.BlockSpec(memory_space=pltpu.MemorySpace.SMEM),   # folded logp const
        ],
        out_specs=(
            pl.BlockSpec((act_dim, block_b), lambda i: (0, i)),  # a^T
            pl.BlockSpec((1, block_b), lambda i: (0, i)),        # v
            pl.BlockSpec((1, block_b), lambda i: (0, i)),        # logp
        ),
        out_shape=(
            jax.ShapeDtypeStruct((act_dim, B_pad), jnp.float32),
            jax.ShapeDtypeStruct((1, B_pad), jnp.float32),
            jax.ShapeDtypeStruct((1, B_pad), jnp.float32),
        ),
        compiler_params=pltpu.CompilerParams(
            dimension_semantics=("parallel",),
            vmem_limit_bytes=32 * 1024 * 1024),
    )(obsT, epsT, w1T, b1T, w2T, b2T, w3T, b3T, std, c)

    # Contiguous row slices (no strided column gathers); one small transpose
    # to hand back the module's (B, act_dim) action layout.
    a = aT[:, :B].T
    v = vT[0, :B]
    logp = logpT[0, :B]
    return a, v, logp


# Pure-JAX reference (f32 everywhere) for a sanity check.
def ppo_forward_ref(obs, eps, params):
    (pw1, pb1, pw2, pb2, pw3, pb3, log_std,
     vw1, vb1, vw2, vb2, vw3, vb3) = params
    h = jnp.tanh(obs @ pw1 + pb1)
    h = jnp.tanh(h @ pw2 + pb2)
    mu = h @ pw3 + pb3
    std = jnp.exp(log_std)
    a = mu + std * eps
    logp = jnp.sum(-0.5 * eps * eps - log_std - 0.5 * _LOG_2PI, axis=-1)
    hv = jnp.tanh(obs @ vw1 + vb1)
    hv = jnp.tanh(hv @ vw2 + vb2)
    v = (hv @ vw3 + vb3)[:, 0]
    return a, v, logp


def _check(B, OBS_DIM, ACT_DIM, HIDDEN, key, **kw):
    k_param, k_obs, k_eps = jax.random.split(key, 3)
    params = init_ppo_params(k_param, OBS_DIM, ACT_DIM, HIDDEN)
    fused = fuse_ppo_params(params)
    obs = jax.random.normal(k_obs, (B, OBS_DIM), dtype=jnp.float32)
    # Standard-normal noise for the Gaussian sample (reparameterization),
    # drawn outside the kernel for determinism vs. the reference.
    eps = jax.random.normal(k_eps, (B, ACT_DIM), dtype=jnp.float32)

    a, v, logp = ppo_forward(obs, eps, fused, **kw)
    jax.block_until_ready((a, v, logp))

    assert a.shape == (B, ACT_DIM)
    assert v.shape == (B,)
    assert logp.shape == (B,)

    a_ref, v_ref, logp_ref = ppo_forward_ref(obs, eps, params)
    # bf16 MXU inputs -> loose tolerance on matmul-derived outputs.
    np.testing.assert_allclose(np.asarray(a), np.asarray(a_ref), atol=5e-2, rtol=5e-2)
    np.testing.assert_allclose(np.asarray(v), np.asarray(v_ref), atol=5e-2, rtol=5e-2)
    np.testing.assert_allclose(np.asarray(logp), np.asarray(logp_ref),
                               atol=1e-4, rtol=1e-4)


if __name__ == "__main__":
    OBS_DIM = 32
    ACT_DIM = 8
    HIDDEN = [64, 64]

    key = jax.random.PRNGKey(0)
    k_small, k_multi = jax.random.split(key)

    # Small single-tile case (B padded up to one 128-lane tile).
    _check(8, OBS_DIM, ACT_DIM, HIDDEN, k_small)
    # Multi-step grid + padding case (3 batch tiles of 128, last one partial).
    _check(300, OBS_DIM, ACT_DIM, HIDDEN, k_multi, block_b=128)

    print("KERNEL_OK")
</pallas_src>

<mosaic_0001>
module attributes {stable_mosaic.version = 11 : i64} {
  func.func @ppo_forward_kernel(%arg0: i32, %arg1: memref<32x128xf32, #tpu.memory_space<vmem>>, %arg2: memref<8x128xf32, #tpu.memory_space<vmem>>, %arg3: memref<128x32xbf16, #tpu.memory_space<vmem>>, %arg4: memref<128x1xf32, #tpu.memory_space<vmem>>, %arg5: memref<128x128xbf16, #tpu.memory_space<vmem>>, %arg6: memref<128x1xf32, #tpu.memory_space<vmem>>, %arg7: memref<9x128xbf16, #tpu.memory_space<vmem>>, %arg8: memref<9x1xf32, #tpu.memory_space<vmem>>, %arg9: memref<8x1xf32, #tpu.memory_space<vmem>>, %arg10: memref<1xf32, #tpu.memory_space<smem>>, %arg11: memref<8x128xf32, #tpu.memory_space<vmem>>, %arg12: memref<1x128xf32, #tpu.memory_space<vmem>>, %arg13: memref<1x128xf32, #tpu.memory_space<vmem>>) attributes {dimension_semantics = [#tpu.dimension_semantics<parallel>], iteration_bounds = array<i64: 1>, scalar_prefetch = 0 : i64, scratch_operands = 0 : i64, tpu.core_type = #tpu.core_type<tc>, window_params = [{transform_indices = @transform_0, window_bounds = array<i64: 32, 128>}, {transform_indices = @transform_1, window_bounds = array<i64: 8, 128>}, {pipeline_mode = #tpu.pipeline_mode<synchronous>, transform_indices = @transform_2, window_bounds = array<i64: 128, 32>}, {pipeline_mode = #tpu.pipeline_mode<synchronous>, transform_indices = @transform_3, window_bounds = array<i64: 128, 1>}, {pipeline_mode = #tpu.pipeline_mode<synchronous>, transform_indices = @transform_4, window_bounds = array<i64: 128, 128>}, {pipeline_mode = #tpu.pipeline_mode<synchronous>, transform_indices = @transform_5, window_bounds = array<i64: 128, 1>}, {pipeline_mode = #tpu.pipeline_mode<synchronous>, transform_indices = @transform_6, window_bounds = array<i64: 9, 128>}, {pipeline_mode = #tpu.pipeline_mode<synchronous>, transform_indices = @transform_7, window_bounds = array<i64: 9, 1>}, {pipeline_mode = #tpu.pipeline_mode<synchronous>, transform_indices = @transform_8, window_bounds = array<i64: 8, 1>}, {transform_indices = @transform_9, window_bounds = array<i64: 1>}, {transform_indices = @transform_10, window_bounds = array<i64: 8, 128>}, {transform_indices = @transform_11, window_bounds = array<i64: 1, 128>}, {transform_indices = @transform_12, window_bounds = array<i64: 1, 128>}]} {
    %c0 = arith.constant 0 : index
    %c0_0 = arith.constant 0 : index
    %0 = vector.load %arg1[%c0, %c0_0] : memref<32x128xf32, #tpu.memory_space<vmem>>, vector<32x128xf32>
    %c0_1 = arith.constant 0 : index
    %c0_2 = arith.constant 0 : index
    %1 = vector.load %arg3[%c0_1, %c0_2] : memref<128x32xbf16, #tpu.memory_space<vmem>>, vector<128x32xbf16>
    %2 = arith.truncf %0 : vector<32x128xf32> to vector<32x128xbf16>
    %cst = arith.constant dense<0.000000e+00> : vector<128x128xf32>
    %3 = tpu.matmul %1, %2, %cst {dimension_numbers = #tpu.dot_dimension_numbers<[1], [0], [0], [1], [0, 0, 1, 1], [], []>} : vector<128x32xbf16>, vector<32x128xbf16>, vector<128x128xf32> -> vector<128x128xf32>
    %c0_3 = arith.constant 0 : index
    %c0_4 = arith.constant 0 : index
    %4 = vector.load %arg4[%c0_3, %c0_4] : memref<128x1xf32, #tpu.memory_space<vmem>>, vector<128x1xf32>
    %5 = vector.broadcast %4 : vector<128x1xf32> to vector<128x128xf32>
    %6 = arith.addf %3, %5 : vector<128x128xf32>
    %7 = math.tanh %6 : vector<128x128xf32>
    %c0_5 = arith.constant 0 : index
    %c0_6 = arith.constant 0 : index
    %8 = vector.load %arg5[%c0_5, %c0_6] : memref<128x128xbf16, #tpu.memory_space<vmem>>, vector<128x128xbf16>
    %9 = arith.truncf %7 : vector<128x128xf32> to vector<128x128xbf16>
    %cst_7 = arith.constant dense<0.000000e+00> : vector<128x128xf32>
    %10 = tpu.matmul %8, %9, %cst_7 {dimension_numbers = #tpu.dot_dimension_numbers<[1], [0], [0], [1], [0, 0, 1, 1], [], []>} : vector<128x128xbf16>, vector<128x128xbf16>, vector<128x128xf32> -> vector<128x128xf32>
    %c0_8 = arith.constant 0 : index
    %c0_9 = arith.constant 0 : index
    %11 = vector.load %arg6[%c0_8, %c0_9] : memref<128x1xf32, #tpu.memory_space<vmem>>, vector<128x1xf32>
    %12 = vector.broadcast %11 : vector<128x1xf32> to vector<128x128xf32>
    %13 = arith.addf %10, %12 : vector<128x128xf32>
    %14 = math.tanh %13 : vector<128x128xf32>
    %c0_10 = arith.constant 0 : index
    %c0_11 = arith.constant 0 : index
    %15 = vector.load %arg7[%c0_10, %c0_11] : memref<9x128xbf16, #tpu.memory_space<vmem>>, vector<9x128xbf16>
    %16 = arith.truncf %14 : vector<128x128xf32> to vector<128x128xbf16>
    %cst_12 = arith.constant dense<0.000000e+00> : vector<9x128xf32>
    %17 = tpu.matmul %15, %16, %cst_12 {dimension_numbers = #tpu.dot_dimension_numbers<[1], [0], [0], [1], [0, 0, 1, 1], [], []>} : vector<9x128xbf16>, vector<128x128xbf16>, vector<9x128xf32> -> vector<9x128xf32>
    %c0_13 = arith.constant 0 : index
    %c0_14 = arith.constant 0 : index
    %18 = vector.load %arg8[%c0_13, %c0_14] : memref<9x1xf32, #tpu.memory_space<vmem>>, vector<9x1xf32>
    %19 = vector.broadcast %18 : vector<9x1xf32> to vector<9x128xf32>
    %20 = arith.addf %17, %19 : vector<9x128xf32>
    %21 = vector.extract_strided_slice %20 {offsets = [0, 0], sizes = [8, 128], strides = [1, 1]} : vector<9x128xf32> to vector<8x128xf32>
    %22 = vector.extract_strided_slice %20 {offsets = [8, 0], sizes = [1, 128], strides = [1, 1]} : vector<9x128xf32> to vector<1x128xf32>
    %c0_15 = arith.constant 0 : index
    %c0_16 = arith.constant 0 : index
    %23 = vector.load %arg2[%c0_15, %c0_16] : memref<8x128xf32, #tpu.memory_space<vmem>>, vector<8x128xf32>
    %c0_17 = arith.constant 0 : index
    %c0_18 = arith.constant 0 : index
    %24 = vector.load %arg9[%c0_17, %c0_18] : memref<8x1xf32, #tpu.memory_space<vmem>>, vector<8x1xf32>
    %25 = vector.broadcast %24 : vector<8x1xf32> to vector<8x128xf32>
    %26 = arith.mulf %25, %23 : vector<8x128xf32>
    %27 = arith.addf %21, %26 : vector<8x128xf32>
    %c0_19 = arith.constant 0 : index
    %c0_20 = arith.constant 0 : index
    %28 = vector.load %arg11[%c0_19, %c0_20] : memref<8x128xf32, #tpu.memory_space<vmem>>, vector<8x128xf32>
    tpu.vector_store %arg11[%c0_19, %c0_20], %27 {strides = array<i32>} : memref<8x128xf32, #tpu.memory_space<vmem>>, vector<8x128xf32>,
    %c0_21 = arith.constant 0 : index
    %c0_22 = arith.constant 0 : index
    %29 = vector.load %arg12[%c0_21, %c0_22] : memref<1x128xf32, #tpu.memory_space<vmem>>, vector<1x128xf32>
    tpu.vector_store %arg12[%c0_21, %c0_22], %22 {strides = array<i32>} : memref<1x128xf32, #tpu.memory_space<vmem>>, vector<1x128xf32>,
    %30 = arith.mulf %23, %23 : vector<8x128xf32>
    %cst_23 = arith.constant dense<0.000000e+00> : vector<128xf32>
    %31 = vector.multi_reduction <add>, %30, %cst_23 [0] : vector<8x128xf32> to vector<128xf32>
    %32 = vector.shape_cast %31 : vector<128xf32> to vector<1x128xf32>
    %cst_24 = arith.constant -5.000000e-01 : f32
    %33 = vector.broadcast %cst_24 : f32 to vector<1x128xf32>
    %34 = arith.mulf %33, %32 : vector<1x128xf32>
    %c0_25 = arith.constant 0 : index
    %35 = memref.load %arg10[%c0_25] : memref<1xf32, #tpu.memory_space<smem>>
    %36 = vector.broadcast %35 : f32 to vector<1x128xf32>
    %37 = arith.addf %34, %36 : vector<1x128xf32>
    %c0_26 = arith.constant 0 : index
    %c0_27 = arith.constant 0 : index
    %38 = vector.load %arg13[%c0_26, %c0_27] : memref<1x128xf32, #tpu.memory_space<vmem>>, vector<1x128xf32>
    tpu.vector_store %arg13[%c0_26, %c0_27], %37 {strides = array<i32>} : memref<1x128xf32, #tpu.memory_space<vmem>>, vector<1x128xf32>,
    return
  }
  func.func @transform_0(%arg0: i32) -> (i32, i32) {
    %c0_i32 = arith.constant 0 : i32
    %c0_i32_0 = arith.constant 0 : i32
    return %c0_i32, %arg0 : i32, i32
  }
  func.func @transform_1(%arg0: i32) -> (i32, i32) {
    %c0_i32 = arith.constant 0 : i32
    %c0_i32_0 = arith.constant 0 : i32
    return %c0_i32, %arg0 : i32, i32
  }
  func.func @transform_2(%arg0: i32) -> (i32, i32) {
    %c0_i32 = arith.constant 0 : i32
    %c0_i32_0 = arith.constant 0 : i32
    %c0_i32_1 = arith.constant 0 : i32
    return %c0_i32, %c0_i32_0 : i32, i32
  }
  func.func @transform_3(%arg0: i32) -> (i32, i32) {
    %c0_i32 = arith.constant 0 : i32
    %c0_i32_0 = arith.constant 0 : i32
    %c0_i32_1 = arith.constant 0 : i32
    return %c0_i32, %c0_i32_0 : i32, i32
  }
  func.func @transform_4(%arg0: i32) -> (i32, i32) {
    %c0_i32 = arith.constant 0 : i32
    %c0_i32_0 = arith.constant 0 : i32
    %c0_i32_1 = arith.constant 0 : i32
    return %c0_i32, %c0_i32_0 : i32, i32
  }
  func.func @transform_5(%arg0: i32) -> (i32, i32) {
    %c0_i32 = arith.constant 0 : i32
    %c0_i32_0 = arith.constant 0 : i32
    %c0_i32_1 = arith.constant 0 : i32
    return %c0_i32, %c0_i32_0 : i32, i32
  }
  func.func @transform_6(%arg0: i32) -> (i32, i32) {
    %c0_i32 = arith.constant 0 : i32
    %c0_i32_0 = arith.constant 0 : i32
    %c0_i32_1 = arith.constant 0 : i32
    return %c0_i32, %c0_i32_0 : i32, i32
  }
  func.func @transform_7(%arg0: i32) -> (i32, i32) {
    %c0_i32 = arith.constant 0 : i32
    %c0_i32_0 = arith.constant 0 : i32
    %c0_i32_1 = arith.constant 0 : i32
    return %c0_i32, %c0_i32_0 : i32, i32
  }
  func.func @transform_8(%arg0: i32) -> (i32, i32) {
    %c0_i32 = arith.constant 0 : i32
    %c0_i32_0 = arith.constant 0 : i32
    %c0_i32_1 = arith.constant 0 : i32
    return %c0_i32, %c0_i32_0 : i32, i32
  }
  func.func @transform_9(%arg0: i32) -> i32 {
    %c0_i32 = arith.constant 0 : i32
    %c0_i32_0 = arith.constant 0 : i32
    return %c0_i32 : i32
  }
  func.func @transform_10(%arg0: i32) -> (i32, i32) {
    %c0_i32 = arith.constant 0 : i32
    %c0_i32_0 = arith.constant 0 : i32
    return %c0_i32, %arg0 : i32, i32
  }
  func.func @transform_11(%arg0: i32) -> (i32, i32) {
    %c0_i32 = arith.constant 0 : i32
    %c0_i32_0 = arith.constant 0 : i32
    return %c0_i32, %arg0 : i32, i32
  }
  func.func @transform_12(%arg0: i32) -> (i32, i32) {
    %c0_i32 = arith.constant 0 : i32
    %c0_i32_0 = arith.constant 0 : i32
    return %c0_i32, %arg0 : i32, i32
  }
}

</mosaic_0001>

<bundles_post_ra>
// kernel: tpu_custom_call.1
= control target key start
LH: loop header
LB: loop body
LE: loop exit
PB: predicated region body
PF: predicated region fallthrough
CT: control target
= control target key end

     0   :  { %19 = vsyncpa [#allocation4], 0  ;;  %vm200_vm0 = vcmask 261120   ;;  %v1043_v5 = vmov 0   ;;  %s1356_s0 = inlined_call_operand.vmem [shape: f32[32,128], index: 0, kind: input, shape index: {}]   ;;  %s1357_s1 = inlined_call_operand.vmem [shape: f32[8,128], index: 1, kind: input, shape index: {}]   ;;  %s1358_s2 = inlined_call_operand.vmem [shape: bf16[128,32], index: 2, kind: input, shape index: {}]   ;;  %s1359_s3 = inlined_call_operand.vmem [shape: f32[128,1], index: 3, kind: input, shape index: {}]   ;;  %s1360_s4 = inlined_call_operand.vmem [shape: bf16[128,128], index: 4, kind: input, shape index: {}]   ;;  %s1361_s5 = inlined_call_operand.vmem [shape: f32[128,1], index: 5, kind: input, shape index: {}]   ;;  %s1362_s6 = inlined_call_operand.vmem [shape: bf16[9,128], index: 6, kind: input, shape index: {}]   ;;  %s1363_s7 = inlined_call_operand.vmem [shape: f32[9,1], index: 7, kind: input, shape index: {}]   ;;  %s1364_s8 = inlined_call_operand.vmem [shape: f32[8,1], index: 8, kind: input, shape index: {}]   ;;  %s1365_s9 = inlined_call_operand.<no memory space> [shape: f32[1], index: 9, kind: input, shape index: {}]   ;;  %s1366_s10 = inlined_call_operand.hbm [shape: f32[8,128], index: 10, kind: output, shape index: {0}]   ;;  %s1367_s11 = inlined_call_operand.hbm [shape: f32[1,128], index: 11, kind: output, shape index: {1}]   ;;  %s1368_s12 = inlined_call_operand.hbm [shape: f32[1,128], index: 12, kind: output, shape index: {2}]  }
   0x1   :  { %v42_v0 = vld [vmem:[%s1356_s0] sm:$0xff]  ;;  %v43_v1 = vld [vmem:[%s1356_s0 + $0x8] sm:$0xff]  ;;  %v44_v2 = vld [vmem:[%s1356_s0 + $0x10] sm:$0xff]  ;;  %890 = vset.pattern.permute.xlu0 %v1043_v5  ;;  %891 = vset.pattern.permute.xlu1 %v1043_v5 }
   0x2   :  { %v62_v3 = vpack.c.bf16 %v43_v1, %v42_v0  ;;  %v45_v4 = vld [vmem:[%s1356_s0 + $0x18] sm:$0xff]  ;;  %v892_v7 = vld [vmem:[%s1358_s2] sm:$0xff]   ;;  %v893_v9 = vld [vmem:[%s1358_s2 + $0x8] sm:$0xff]  }
   0x3   :  { %v63_v6 = vpack.c.bf16 %v45_v4, %v44_v2  ;;  %816 = vmatprep.mubr.msk.bf16.mxu0 %vm200_vm0, %v892_v7  ;;  %v64_v8 = vld [vmem:[%s1359_s3] sm:$0xff]  ;;  %v65_v10 = vld [vmem:[%s1359_s3 + $0x8] sm:$0xff]  ;;  %v894_v11 = vld [vmem:[%s1358_s2 + $0x10] sm:$0xff]  }
   0x4   :  { %812 = vmatprep.subr.bf16.mxu0 %v62_v3  ;;  %82 = vperm.xlu0 %890, %v64_v8   ;;  %v66_v12 = vld [vmem:[%s1359_s3 + $0x10] sm:$0xff]  ;;  %v67_v13 = vld [vmem:[%s1359_s3 + $0x18] sm:$0xff]  ;;  %v68_v14 = vld [vmem:[%s1359_s3 + $0x20] sm:$0xff] }
   0x5   :  { %813 = vmatpush3.bf16.msra.mxu0 %v62_v3  ;;  %92 = vperm.xlu1 %891, %v66_v12   ;;  %v69_v15 = vld [vmem:[%s1359_s3 + $0x28] sm:$0xff]  ;;  %v895_v16 = vld [vmem:[%s1358_s2 + $0x18] sm:$0xff]   ;;  %v70_v17 = vld [vmem:[%s1359_s3 + $0x30] sm:$0xff] }
   0x6   :  { %814 = vmatprep.subr.bf16.mxu0 %v63_v6  ;;  %v896_v18 = vld [vmem:[%s1358_s2 + $0x20] sm:$0xff]   ;;  %v71_v19 = vld [vmem:[%s1359_s3 + $0x38] sm:$0xff]  ;;  %v73_v21 = vld [vmem:[%s1359_s3 + $0x48] sm:$0xff] }
   0x7   :  { %v72_v20 = vld [vmem:[%s1359_s3 + $0x40] sm:$0xff]  ;;  %v897_v22 = vld [vmem:[%s1358_s2 + $0x28] sm:$0xff]   ;;  %v74_v23 = vld [vmem:[%s1359_s3 + $0x50] sm:$0xff] }
   0x8   :  { %87 = vperm.xlu0 %890, %v65_v10   ;;  %v898_v24 = vld [vmem:[%s1358_s2 + $0x30] sm:$0xff]   ;;  %v75_v25 = vld [vmem:[%s1359_s3 + $0x58] sm:$0xff]  ;;  %v76_v26 = vld [vmem:[%s1359_s3 + $0x60] sm:$0xff] }
   0x9   :  { %815 = vmatpush3.bf16.msra.mxu0 %v63_v6  ;;  %97 = vperm.xlu1 %891, %v67_v13  }
   0xc   :  { %817 = vmatmul.mubr.msk.bf16.vlgmr.msra.gmra.mrb[0].mxu0 %vm200_vm0, %v893_v9  ;;  %102 = vperm.xlu0 %890, %v68_v14  }
   0xd   :  { %820 = vmatprep.mubr.msk.bf16.mxu0 %vm200_vm0, %v894_v11  ;;  %107 = vperm.xlu1 %891, %v69_v15  }
  0x10   :  { %112 = vperm.xlu0 %890, %v70_v17  }
  0x11   :  { %117 = vperm.xlu1 %891, %v71_v19  }
  0x14   :  { %821 = vmatmul.mubr.msk.bf16.gmra.mrb[4].mxu0 %vm200_vm0, %v895_v16  ;;  %122 = vperm.xlu0 %890, %v72_v20  }
  0x15   :  { %824 = vmatprep.mubr.msk.bf16.mxu0 %vm200_vm0, %v896_v18  ;;  %127 = vperm.xlu1 %891, %v73_v21  }
  0x18   :  { %132 = vperm.xlu0 %890, %v74_v23  }
  0x1c   :  { %825 = vmatmul.mubr.msk.bf16.gmra.mrb[8].mxu0 %vm200_vm0, %v897_v22 }
  0x1d   :  { %20 = vsyncpa [#allocation6], 0  ;;  %828 = vmatprep.mubr.msk.bf16.mxu0 %vm200_vm0, %v898_v24  ;;  %137 = vperm.xlu1 %891, %v75_v25   ;;  %v77_v27 = vld [vmem:[%s1359_s3 + $0x68] sm:$0xff]  ;;  %v899_v28 = vld [vmem:[%s1358_s2 + $0x38] sm:$0xff]   ;;  %vm1045_vm1 = vmmov 0   ;;  %s1048_s15 = smov [#allocation7]  }
  0x1e   :  { %142 = vperm.xlu0 %890, %v76_v26   ;;  %v78_v29 = vld [vmem:[%s1359_s3 + $0x70] sm:$0xff]  ;;  %v79_v30 = vld [vmem:[%s1359_s3 + $0x78] sm:$0xff]  ;;  %v362_v31 = vld [vmem:[%s1361_s5] sm:$0xff]  ;;  %s737_s16 = sshll.u32 %s1048_s15, 4  ;;  %s1307_s16 = int_to_ptr.vmem [resolvable:$true] %s737_s16 }
  0x1f   :  { %v363_v32 = vld [vmem:[%s1361_s5 + $0x8] sm:$0xff]  ;;  %v364_v33 = vld [vmem:[%s1361_s5 + $0x10] sm:$0xff]  ;;  %v365_v34 = vld [vmem:[%s1361_s5 + $0x18] sm:$0xff] }
  0x20   :  { %v366_v35 = vld [vmem:[%s1361_s5 + $0x20] sm:$0xff]  ;;  %v367_v36 = vld [vmem:[%s1361_s5 + $0x28] sm:$0xff]  ;;  %v368_v37 = vld [vmem:[%s1361_s5 + $0x30] sm:$0xff] }
  0x21   :  { %147 = vperm.xlu1 %891, %v77_v27   ;;  %v369_v38 = vld [vmem:[%s1361_s5 + $0x38] sm:$0xff]  ;;  %v370_v39 = vld [vmem:[%s1361_s5 + $0x40] sm:$0xff]  ;;  %v371_v40 = vld [vmem:[%s1361_s5 + $0x48] sm:$0xff] }
  0x22   :  { %152 = vperm.xlu0 %890, %v78_v29   ;;  %v372_v41 = vld [vmem:[%s1361_s5 + $0x50] sm:$0xff]  ;;  %v373_v42 = vld [vmem:[%s1361_s5 + $0x58] sm:$0xff]  ;;  %v374_v43 = vld [vmem:[%s1361_s5 + $0x60] sm:$0xff] }
  0x23   :  { %v375_v44 = vld [vmem:[%s1361_s5 + $0x68] sm:$0xff]  ;;  %v376_v45 = vld [vmem:[%s1361_s5 + $0x70] sm:$0xff]  ;;  %v377_v46 = vld [vmem:[%s1361_s5 + $0x78] sm:$0xff] }
  0x24   :  { %829 = vmatmul.mubr.msk.bf16.gmra.mrb[12].mxu0 %vm200_vm0, %v899_v28  ;;  %v629_v47 = vld [vmem:[%s1363_s7] sm:$0xff]  ;;  %v630_v49 = vld [vmem:[%s1363_s7 + $0x8] sm:$0x1] }
  0x25   :  { %157 = vperm.xlu1 %891, %v79_v30   ;;  %v689_v48 = vld [vmem:[%s1364_s8] sm:$0xff] }
  0x26   :  { %380 = vperm.xlu0 %890, %v362_v31   ;;  %v900_v50 = vld [vmem:[%s1360_s4] sm:$0xff]  }
  0x27   :  { %848 = vmatprep.mubr.bf16.mxu1 %v900_v50 }
  0x29   :  { %385 = vperm.xlu1 %891, %v363_v32  }
  0x2a   :  { %390 = vperm.xlu0 %890, %v364_v33  }
  0x2d   :  { %395 = vperm.xlu1 %891, %v365_v34  }
  0x2e   :  { %400 = vperm.xlu0 %890, %v366_v35  }
  0x31   :  { %405 = vperm.xlu1 %891, %v367_v36  }
  0x32   :  { %410 = vperm.xlu0 %890, %v368_v37  }
  0x35   :  { %415 = vperm.xlu1 %891, %v369_v38  }
  0x36   :  { %420 = vperm.xlu0 %890, %v370_v39  }
  0x39   :  { %425 = vperm.xlu1 %891, %v371_v40  }
  0x3a   :  { %430 = vperm.xlu0 %890, %v372_v41  }
  0x3d   :  { %435 = vperm.xlu1 %891, %v373_v42  }
  0x3e   :  { %440 = vperm.xlu0 %890, %v374_v43  }
  0x41   :  { %445 = vperm.xlu1 %891, %v375_v44  }
  0x42   :  { %450 = vperm.xlu0 %890, %v376_v45  }
  0x45   :  { %455 = vperm.xlu1 %891, %v377_v46  }
  0x46   :  { %633 = vperm.xlu0 %890, %v629_v47  }
  0x49   :  { %692 = vperm.xlu1 %891, %v689_v48  }
  0x4a   :  { %638 = vperm.xlu0 %890, %v630_v49  }
  0x83   :  { %v83_v51 = vpop.permute.xlu0 %82 }
  0x84   :  { %v93_v52 = vpop.permute.xlu1 %92 }
  0x87   :  { %v88_v53 = vpop.permute.xlu0 %87 }
  0x88   :  { %v98_v54 = vpop.permute.xlu1 %97 }
  0x8b   :  { %v103_v55 = vpop.permute.xlu0 %102 }
  0x8c   :  { %v108_v56 = vpop.permute.xlu1 %107 }
  0x8f   :  { %v113_v57 = vpop.permute.xlu0 %112 }
  0x90   :  { %v118_v61 = vpop.permute.xlu1 %117 }
  0x93   :  { %v123_v3 = vpop.permute.xlu0 %122 }
  0x94   :  { %v128_v4 = vpop.permute.xlu1 %127 }
  0x97   :  { %v133_v12 = vpop.permute.xlu0 %132 }
  0x9c   :  { %v138_v16 = vpop.permute.xlu1 %137 }
  0x9d   :  { %v143_v24 = vpop.permute.xlu0 %142 }
  0xa0   :  { %v148_v29 = vpop.permute.xlu1 %147 }
  0xa1   :  { %v153_v35 = vpop.permute.xlu0 %152 }
  0xa4   :  { %v158_v41 = vpop.permute.xlu1 %157 }
  0xdf   :  { %v818_v58 = vpop.f32.mrb[0].mxu0 }
  0xe0   :  { %v268_v59 = vadd.f32 %v818_v58, %v93_v52  ;;  %v259_v60 = vpop.f32.mrb[1].mxu0 }
  0xe1   :  { %v260_v62 = vadd.f32 %v259_v60, %v83_v51  ;;  %v819_v63 = vpop.f32.mrb[2].mxu0  ;;  %v902_v60 = vld [vmem:[%s1360_s4 + $0x10] sm:$0xff]  }
  0xe2   :  { %909 = vtanh.f32 %v268_v59  ;;  %v271_v0 = vadd.f32 %v819_v63, %v98_v54  ;;  %v262_v1 = vpop.f32.mrb[3].mxu0  ;;  %v901_v59 = vld [vmem:[%s1360_s4 + $0x8] sm:$0xff]  }
  0xe3   :  { %911 = vtanh.f32 %v260_v62  ;;  %v263_v2 = vadd.f32 %v262_v1, %v88_v53  ;;  %v904_v62 = vld [vmem:[%s1360_s4 + $0x20] sm:$0xff]   ;;  %v905_v63 = vld [vmem:[%s1360_s4 + $0x28] sm:$0xff]   ;;  %v907_v1 = vld [vmem:[%s1360_s4 + $0x38] sm:$0xff]  }
  0xe4   :  { %913 = vtanh.f32 %v271_v0  ;;  %v906_v0 = vld [vmem:[%s1360_s4 + $0x30] sm:$0xff]  }
  0xe5   :  { %915 = vtanh.f32 %v263_v2  ;;  %v1044_v2 = vmov 0.0  }
  0xe6   :  { %864 = vmatprep.subr.bf16.mxu0 %v1044_v2  ;;  %880 = vmatprep.mubr.msk.bf16.mxu0 %vm1045_vm1, %v1044_v2 }
  0xe7   :  { %v822_v5 = vpop.f32.mrb[4].mxu0 }
  0xe8   :  { %v284_v6 = vadd.f32 %v822_v5, %v113_v57  ;;  %v275_v7 = vpop.f32.mrb[5].mxu0 }
  0xe9   :  { %v276_v8 = vadd.f32 %v275_v7, %v103_v55  ;;  %v823_v9 = vpop.f32.mrb[6].mxu0 }
  0xea   :  { %917 = vtanh.f32 %v284_v6  ;;  %v287_v10 = vadd.f32 %v823_v9, %v118_v61  ;;  %v278_v11 = vpop.f32.mrb[7].mxu0  ;;  %v903_v61 = vld [vmem:[%s1360_s4 + $0x18] sm:$0xff]  }
  0xeb   :  { %919 = vtanh.f32 %v276_v8  ;;  %v279_v13 = vadd.f32 %v278_v11, %v108_v56 }
  0xec   :  { %v910_v14 = vpop.eup %909  ;;  %921 = vtanh.f32 %v287_v10 }
  0xed   :  { %v912_v15 = vpop.eup %911  ;;  %923 = vtanh.f32 %v279_v13 }
  0xee   :  { %v914_v17 = vpop.eup %913 }
  0xef   :  { %v916_v18 = vpop.eup %915  ;;  %v826_v19 = vpop.f32.mrb[8].mxu0  ;;  %v355_v20 = vpack.c.bf16 %v914_v17, %v910_v14 }
  0xf0   :  { %v300_v21 = vadd.f32 %v826_v19, %v133_v12  ;;  %v291_v22 = vpop.f32.mrb[9].mxu0  ;;  %v354_v23 = vpack.c.bf16 %v916_v18, %v912_v15 }
  0xf1   :  { %v292_v25 = vadd.f32 %v291_v22, %v123_v3  ;;  %v827_v26 = vpop.f32.mrb[10].mxu0  ;;  %v381_v3 = vpop.permute.xlu0 %380 }
  0xf2   :  { %925 = vtanh.f32 %v300_v21  ;;  %v303_v27 = vadd.f32 %v827_v26, %v138_v16  ;;  %v294_v28 = vpop.f32.mrb[11].mxu0  ;;  %832 = vmatprep.subr.bf16.mxu1 %v354_v23 }
  0xf3   :  { %927 = vtanh.f32 %v292_v25  ;;  %v295_v30 = vadd.f32 %v294_v28, %v128_v4  ;;  %833 = vmatpush3.bf16.msra.mxu1 %v354_v23  ;;  %v386_v4 = vpop.permute.xlu1 %385 }
  0xf4   :  { %v918_v31 = vpop.eup %917  ;;  %929 = vtanh.f32 %v303_v27  ;;  %834 = vmatprep.subr.bf16.mxu1 %v355_v20 }
  0xf5   :  { %v920_v32 = vpop.eup %919  ;;  %931 = vtanh.f32 %v295_v30  ;;  %v391_v5 = vpop.permute.xlu0 %390 }
  0xf6   :  { %v922_v33 = vpop.eup %921 }
  0xf7   :  { %v924_v34 = vpop.eup %923  ;;  %v830_v36 = vpop.f32.mrb[12].mxu0  ;;  %835 = vmatpush3.bf16.msra.mxu1 %v355_v20  ;;  %v357_v37 = vpack.c.bf16 %v922_v33, %v918_v31 }
  0xf8   :  { %v316_v38 = vadd.f32 %v830_v36, %v153_v35  ;;  %v307_v39 = vpop.f32.mrb[13].mxu0  ;;  %v356_v40 = vpack.c.bf16 %v924_v34, %v920_v32  ;;  %v396_v6 = vpop.permute.xlu1 %395 }
  0xf9   :  { %v308_v42 = vadd.f32 %v307_v39, %v143_v24  ;;  %v831_v43 = vpop.f32.mrb[14].mxu0  ;;  %v401_v7 = vpop.permute.xlu0 %400 }
  0xfa   :  { %933 = vtanh.f32 %v316_v38  ;;  %v319_v44 = vadd.f32 %v831_v43, %v158_v41  ;;  %v310_v45 = vpop.f32.mrb[15].mxu0  ;;  %836 = vmatprep.subr.bf16.mxu1 %v356_v40 }
  0xfb   :  { %935 = vtanh.f32 %v308_v42  ;;  %v311_v46 = vadd.f32 %v310_v45, %v148_v29  ;;  %837 = vmatpush3.bf16.msra.mxu1 %v356_v40 }
  0xfc   :  { %v926_v47 = vpop.eup %925  ;;  %937 = vtanh.f32 %v319_v44  ;;  %838 = vmatprep.subr.bf16.mxu1 %v357_v37  ;;  %v406_v8 = vpop.permute.xlu1 %405 }
  0xfd   :  { %v928_v48 = vpop.eup %927  ;;  %939 = vtanh.f32 %v311_v46  ;;  %v411_v9 = vpop.permute.xlu0 %410 }
  0xfe   :  { %v930_v49 = vpop.eup %929 }
  0xff   :  { %v932_v50 = vpop.eup %931  ;;  %839 = vmatpush3.bf16.msra.mxu1 %v357_v37  ;;  %v359_v51 = vpack.c.bf16 %v930_v49, %v926_v47 }
 0x100   :  { %v358_v52 = vpack.c.bf16 %v932_v50, %v928_v48  ;;  %v416_v13 = vpop.permute.xlu1 %415 }
 0x101   :  { %v421_v19 = vpop.permute.xlu0 %420 }
 0x102   :  { %840 = vmatprep.subr.bf16.mxu1 %v358_v52 }
 0x103   :  { %841 = vmatpush3.bf16.msra.mxu1 %v358_v52 }
 0x104   :  { %v934_v53 = vpop.eup %933  ;;  %842 = vmatprep.subr.bf16.mxu1 %v359_v51  ;;  %v426_v20 = vpop.permute.xlu1 %425 }
 0x105   :  { %v936_v54 = vpop.eup %935  ;;  %v431_v28 = vpop.permute.xlu0 %430 }
 0x106   :  { %v938_v55 = vpop.eup %937 }
 0x107   :  { %v940_v56 = vpop.eup %939  ;;  %843 = vmatpush3.bf16.msra.mxu1 %v359_v51  ;;  %v361_v57 = vpack.c.bf16 %v938_v55, %v934_v53 }
 0x108   :  { %v360_v58 = vpack.c.bf16 %v940_v56, %v936_v54  ;;  %v436_v32 = vpop.permute.xlu1 %435 }
 0x109   :  { %v441_v40 = vpop.permute.xlu0 %440 }
 0x10a   :  { %844 = vmatprep.subr.bf16.mxu1 %v360_v58 }
 0x10b   :  { %845 = vmatpush3.bf16.msra.mxu1 %v360_v58 }
 0x10c   :  { %846 = vmatprep.subr.bf16.mxu1 %v361_v57  ;;  %v446_v45 = vpop.permute.xlu1 %445 }
 0x10d   :  { %v451_v51 = vpop.permute.xlu0 %450 }
 0x10f   :  { %847 = vmatpush3.bf16.msra.mxu1 %v361_v57 }
 0x110   :  { %v456_v57 = vpop.permute.xlu1 %455 }
 0x112   :  { %849 = vmatmul.mubr.bf16.vlgmr.msra.gmra.mrb[0].mxu1 %v901_v59 }
 0x113   :  { %852 = vmatprep.mubr.bf16.mxu1 %v902_v60 }
 0x11a   :  { %853 = vmatmul.mubr.bf16.gmra.mrb[4].mxu1 %v903_v61 }
 0x11b   :  { %856 = vmatprep.mubr.bf16.mxu1 %v904_v62 }
 0x122   :  { %857 = vmatmul.mubr.bf16.gmra.mrb[8].mxu1 %v905_v63 }
 0x123   :  { %860 = vmatprep.mubr.bf16.mxu1 %v906_v0 }
 0x12a   :  { %861 = vmatmul.mubr.bf16.gmra.mrb[12].mxu1 %v907_v1 }
 0x1e5   :  { %v850_v10 = vpop.f32.mrb[0].mxu1 }
 0x1e6   :  { %v549_v11 = vadd.f32 %v850_v10, %v391_v5  ;;  %v540_v12 = vpop.f32.mrb[1].mxu1 }
 0x1e7   :  { %v541_v14 = vadd.f32 %v540_v12, %v381_v3  ;;  %v851_v15 = vpop.f32.mrb[2].mxu1  ;;  %v908_v12 = vld [vmem:[%s1362_s6] sm:$0x1f]   ;;  %s1046_s6 = smov [#allocation5]  }
 0x1e8   :  { %941 = vtanh.f32 %v549_v11  ;;  %v552_v16 = vadd.f32 %v851_v15, %v396_v6  ;;  %v543_v17 = vpop.f32.mrb[3].mxu1  ;;  %s727_s14 = sshll.u32 %s1046_s6, 4  ;;  %s728_s14 = int_to_ptr.vmem [resolvable:$true] %s727_s14 }
 0x1e9   :  { %943 = vtanh.f32 %v541_v14  ;;  %v544_v18 = vadd.f32 %v543_v17, %v386_v4  ;;  %s977_s17 = scalar_lea.vmem %s728_s14, 32  ;;  %p978_p1 = scmp.lt.s32.totalorder %s728_s14, %s728_s14 }
 0x1ea   :  { %945 = vtanh.f32 %v552_v16 }
 0x1eb   :  { %947 = vtanh.f32 %v544_v18 }
 0x1ed   :  { %v854_v21 = vpop.f32.mrb[4].mxu1 }
 0x1ee   :  { %v565_v22 = vadd.f32 %v854_v21, %v411_v9  ;;  %v556_v23 = vpop.f32.mrb[5].mxu1 }
 0x1ef   :  { %v557_v24 = vadd.f32 %v556_v23, %v401_v7  ;;  %v855_v25 = vpop.f32.mrb[6].mxu1  ;;  %v634_v23 = vpop.permute.xlu0 %633 }
 0x1f0   :  { %949 = vtanh.f32 %v565_v22  ;;  %v568_v26 = vadd.f32 %v855_v25, %v416_v13  ;;  %v559_v27 = vpop.f32.mrb[7].mxu1  ;;  %v688_v13 = vld [vmem:[%s1357_s1] sm:$0xff]  ;;  %s1047_s1 = smov [#allocation3]  }
 0x1f1   :  { %951 = vtanh.f32 %v557_v24  ;;  %v560_v29 = vadd.f32 %v559_v27, %v406_v8  ;;  %v699_v14 = vmul.f32 %v688_v13, %v688_v13  ;;  %v693_v24 = vpop.permute.xlu1 %692  ;;  %s717_s0 = sshll.u32 %s1047_s1, 4  ;;  %s1305_s0 = int_to_ptr.vmem [resolvable:$true] %s717_s0 }
 0x1f2   :  { %v942_v30 = vpop.eup %941  ;;  %953 = vtanh.f32 %v568_v26  ;;  %v695_v26 = vmul.f32 %v693_v24, %v688_v13 }
 0x1f3   :  { %v944_v31 = vpop.eup %943  ;;  %955 = vtanh.f32 %v560_v29  ;;  %v700_v15 = vrot.slane %v699_v14, 4  ;;  %v639_v29 = vpop.permute.xlu0 %638 }
 0x1f4   :  { %v946_v33 = vpop.eup %945 }
 0x1f5   :  { %v948_v34 = vpop.eup %947  ;;  %v858_v35 = vpop.f32.mrb[8].mxu1  ;;  %v622_v36 = vpack.c.bf16 %v946_v33, %v942_v30  ;;  %v701_v16 = vadd.f32 %v700_v15, %v699_v14 }
 0x1f6   :  { %v581_v37 = vadd.f32 %v858_v35, %v431_v28  ;;  %v572_v38 = vpop.f32.mrb[9].mxu1  ;;  %v621_v39 = vpack.c.bf16 %v948_v34, %v944_v31 }
 0x1f7   :  { %v573_v41 = vadd.f32 %v572_v38, %v421_v19  ;;  %v859_v42 = vpop.f32.mrb[10].mxu1  ;;  %v702_v17 = vrot.slane %v701_v16, 2 }
 0x1f8   :  { %957 = vtanh.f32 %v581_v37  ;;  %v584_v43 = vadd.f32 %v859_v42, %v436_v32  ;;  %v575_v44 = vpop.f32.mrb[11].mxu1  ;;  %865 = vmatpush3.bf16.msra.mxu0 %v621_v39 }
 0x1f9   :  { %959 = vtanh.f32 %v573_v41  ;;  %v576_v46 = vadd.f32 %v575_v44, %v426_v20  ;;  %866 = vmatprep.subr.bf16.mxu0 %v1044_v2  ;;  %v703_v18 = vadd.f32 %v702_v17, %v701_v16 }
 0x1fa   :  { %v950_v47 = vpop.eup %949  ;;  %961 = vtanh.f32 %v584_v43 }
 0x1fb   :  { %v952_v48 = vpop.eup %951  ;;  %963 = vtanh.f32 %v576_v46  ;;  %v704_v19 = vrot.slane %v703_v18, 1 }
 0x1fc   :  { %v954_v49 = vpop.eup %953  ;;  %867 = vmatpush3.bf16.msra.mxu0 %v622_v36 }
 0x1fd   :  { %v956_v50 = vpop.eup %955  ;;  %v862_v52 = vpop.f32.mrb[12].mxu1  ;;  %868 = vmatprep.subr.bf16.mxu0 %v1044_v2  ;;  %v624_v53 = vpack.c.bf16 %v954_v49, %v950_v47  ;;  %v705_v20 = vadd.f32 %v704_v19, %v703_v18 }
 0x1fe   :  { %v597_v54 = vadd.f32 %v862_v52, %v451_v51  ;;  %v588_v55 = vpop.f32.mrb[13].mxu1  ;;  %v623_v56 = vpack.c.bf16 %v956_v50, %v952_v48 }
 0x1ff   :  { %v589_v58 = vadd.f32 %v588_v55, %v441_v40  ;;  %v863_v59 = vpop.f32.mrb[14].mxu1  ;;  %v706_v21 = vmul.f32 -0.5, %v705_v20 }
 0x200   :  { %965 = vtanh.f32 %v597_v54  ;;  %v600_v60 = vadd.f32 %v863_v59, %v456_v57  ;;  %v591_v61 = vpop.f32.mrb[15].mxu1  ;;  %869 = vmatpush3.bf16.msra.mxu0 %v623_v56 }
 0x201   :  { %967 = vtanh.f32 %v589_v58  ;;  %v592_v62 = vadd.f32 %v591_v61, %v446_v45  ;;  %870 = vmatprep.subr.bf16.mxu0 %v1044_v2 }
 0x202   :  { %v958_v63 = vpop.eup %957  ;;  %969 = vtanh.f32 %v600_v60 }
 0x203   :  { %v960_v0 = vpop.eup %959  ;;  %971 = vtanh.f32 %v592_v62 }
 0x204   :  { %v962_v1 = vpop.eup %961  ;;  %871 = vmatpush3.bf16.msra.mxu0 %v624_v53 }
 0x205   :  { %v964_v3 = vpop.eup %963  ;;  %872 = vmatprep.subr.bf16.mxu0 %v1044_v2  ;;  %v626_v4 = vpack.c.bf16 %v962_v1, %v958_v63 }
 0x206   :  { %v625_v5 = vpack.c.bf16 %v964_v3, %v960_v0 }
 0x208   :  { %873 = vmatpush3.bf16.msra.mxu0 %v625_v5 }
 0x209   :  { %874 = vmatprep.subr.bf16.mxu0 %v1044_v2 }
 0x20a   :  { %v966_v6 = vpop.eup %965 }
 0x20b   :  { %v968_v7 = vpop.eup %967 }
 0x20c   :  { %v970_v8 = vpop.eup %969  ;;  %875 = vmatpush3.bf16.msra.mxu0 %v626_v4 }
 0x20d   :  { %v972_v9 = vpop.eup %971  ;;  %876 = vmatprep.subr.bf16.mxu0 %v1044_v2  ;;  %v628_v10 = vpack.c.bf16 %v970_v8, %v966_v6 }
 0x20e   :  { %v627_v11 = vpack.c.bf16 %v972_v9, %v968_v7 }
 0x210   :  { %877 = vmatpush3.bf16.msra.mxu0 %v627_v11 }
 0x211   :  { %878 = vmatprep.subr.bf16.mxu0 %v1044_v2  ;;  %v708_v2 = vstv %s1365_s9  ;;  %s973_s9 = scalar_lea.vmem %s728_s14, 16 }
 0x212   :  { %v709_v22 = vadd.f32 %v708_v2, %v706_v21  ;;  %p974_p0 = scmp.ne.s32.totalorder %s728_s14, %s973_s9  ;;  %p979_p2 = scmp.lt.s32.totalorder %s977_s17, %s973_s9 }
 0x214   :  { %879 = vmatpush3.bf16.msra.mxu0 %v628_v10  ;;  %710 = vst [vmem:[#allocation7] sm:$0x1] %v709_v22  ;;  %p980_p3 = por %p979_p2, %p978_p1 }
 0x216   :  { %p981_p4 = pnand %p980_p3, %p974_p0 }
 0x217   :  { %881 = vmatmul.mubr.bf16.vlgmr.msra.gmra.mrb[16].mxu0 %v908_v12 }
 0x2ea   :  { %v681_v25 = vpop.f32.mrb[16].mxu0 }
 0x2eb   :  { %v682_v27 = vadd.f32 %v681_v25, %v634_v23  ;;  %v882_v28 = vpop.f32.mrb[17].mxu0 }
 0x2ec   :  { %v684_v30 = vpop.f32.mrb[18].mxu0 }
 0x2ed   :  { %v685_v31 = vadd.f32 %v684_v30, %v639_v29  ;;  %v883_v32 = vpop.f32.mrb[19].mxu0  ;;  %v696_v33 = vadd.f32 %v695_v26, %v682_v27 }
 0x2ef   :  { %698 = vst [vmem:[#allocation5] sm:$0x1] %v685_v31  ;;  %697 = vst [vmem:[#allocation3] sm:$0xff] %v696_v33 }
 0x2f0   :  { %984 = shalt.err (!%p981_p4)
}
 0x2f1   :  { %s985_s8 = scalar_lea.hbm %s1367_s11, 16 }
 0x2f2   :  { %p986_p5 = scmp.ne.s32.totalorder %s1367_s11, %s985_s8  ;;  %p989_p6 = scmp.lt.u32.totalorder %s985_s8, %s1367_s11 }
 0x2f4   :  { %p991_p7 = pnand %p989_p6, %p986_p5 }
 0x2f6   :  { %994 = shalt.err (!%p991_p7)
}
 0x2f7   :  { %730 = dma.vmem_to_hbm [thread:$0]  %s728_s14, 16, %s1367_s11, [#allocation6]  }
 0x2f8   :  { %s995_s23 = scalar_lea.vmem %s1305_s0, 128  ;;  %p1000_p9 = scmp.lt.s32.totalorder %s1305_s0, %s1305_s0 }
 0x2f9   :  { %p996_p8 = scmp.ne.s32.totalorder %s1305_s0, %s995_s23  ;;  %p1001_p10 = scmp.lt.s32.totalorder %s995_s23, %s995_s23 }
 0x2fb   :  { %p1002_p11 = por %p1001_p10, %p1000_p9 }
 0x2fd   :  { %p1003_p12 = pnand %p1002_p11, %p996_p8 }
 0x2ff   :  { %1006 = shalt.err (!%p1003_p12)
}
 0x300   :  { %s1007_s3 = scalar_lea.hbm %s1366_s10, 128 }
 0x301   :  { %p1008_p13 = scmp.ne.s32.totalorder %s1366_s10, %s1007_s3  ;;  %p1011_p0 = scmp.lt.u32.totalorder %s1007_s3, %s1366_s10 }
 0x303   :  { %p1013_p1 = pnand %p1011_p0, %p1008_p13 }
 0x305   :  { %1016 = shalt.err (!%p1013_p1)
}
 0x306   :  { %720 = dma.vmem_to_hbm [thread:$0]  %s1305_s0, 128, %s1366_s10, [#allocation4]  }
 0x307   :  { %s1017_s30 = scalar_lea.vmem %s1307_s16, 16  ;;  %s1021_s13 = scalar_lea.vmem %s1307_s16, 32 }
 0x308   :  { %p1018_p2 = scmp.ne.s32.totalorder %s1307_s16, %s1017_s30  ;;  %p1022_p3 = scmp.lt.s32.totalorder %s1307_s16, %s1307_s16 }
 0x309   :  { %p1023_p4 = scmp.lt.s32.totalorder %s1021_s13, %s1017_s30 }
 0x30b   :  { %p1024_p5 = por %p1023_p4, %p1022_p3 }
 0x30d   :  { %p1025_p6 = pnand %p1024_p5, %p1018_p2 }
 0x30f   :  { %1028 = shalt.err (!%p1025_p6)
}
 0x310   :  { %s1029_s1 = scalar_lea.hbm %s1368_s12, 16 }
 0x311   :  { %p1030_p7 = scmp.ne.s32.totalorder %s1368_s12, %s1029_s1  ;;  %p1033_p8 = scmp.lt.u32.totalorder %s1029_s1, %s1368_s12 }
 0x313   :  { %p1035_p9 = pnand %p1033_p8, %p1030_p7 }
 0x315   :  { %1038 = shalt.err (!%p1035_p9)
}
 0x316   :  { %740 = dma.vmem_to_hbm [thread:$0]  %s1307_s16, 16, %s1368_s12, [#allocation6]  }
 0x317   :  { %1039 = dma.done.wait [#allocation4], 128  }
 0x318   :  { %1040 = vsyncadd [#allocation4], 4294967168 }
 0x319   :  { %1041 = dma.done.wait [#allocation6], 32  }
 0x31a   :  { %1042 = vsyncadd [#allocation6], 4294967264 }
 0x31b   :  { %750 = vsyncpa [#allocation4], 1 }
 0x31c   :  { %751 = vsyncpa [#allocation6], 1 }

</bundles_post_ra>
